<compile_context>
chip_gen: v7x
topology: tpu7x:2x2x1
jax: 0.10.0
libtpu: 0.0.40
codegen_flags: <defaults>
</compile_context>

<pallas_src>
import math
import jax
import jax.numpy as jnp
from jax.experimental import pallas as pl
from jax.experimental.pallas import tpu as pltpu

MXU_DTYPE = jnp.bfloat16   # matmul operand dtype (f32 accumulation everywhere)
NEG_INF = -1e9


# ----------------------------------------------------------------------------
# small helpers
# ----------------------------------------------------------------------------

def _round_up(x, m):
    return ((x + m - 1) // m) * m


def _pick_tile(dim, candidates):
    for c in candidates:
        if dim % c == 0:
            return c
    return dim


def _pad2(x, rows, cols):
    r, c = x.shape
    if r == rows and c == cols:
        return x
    return jnp.pad(x, ((0, rows - r), (0, cols - c)))


def _row_tiles(M):
    Mp = _round_up(M, 8)
    tm = _pick_tile(Mp, (256, 128, 64, 32, 16, 8))
    return Mp, tm


def _col_tiles(N, force_single=False):
    Np = _round_up(N, 128)
    tn = Np if force_single else _pick_tile(Np, (512, 256, 128))
    return Np, tn


# ----------------------------------------------------------------------------
# Pallas kernels
# ----------------------------------------------------------------------------

def pallas_linear(x, w, b, *, activation=None, residual=None, logsoftmax=False):
    """Tiled o = act(x @ w + b) [+ residual] [-> log_softmax].

    x:(M,K) w:(K,N) b:(N,)  residual:(M,N) optional.
    Grid (M/tm, N/tn, K/tk), f32 accumulator scratch, epilogue fused at k==last.
    """
    M, K = x.shape
    N = w.shape[1]
    Mp, tm = _row_tiles(M)
    Np, tn = _col_tiles(N, force_single=logsoftmax)
    tk = _pick_tile(K, (512, 256, 128)) if K % 128 == 0 else K

    xp = _pad2(x, Mp, K)
    wp = _pad2(w, K, Np)
    bp = _pad2(b.reshape(1, N), 1, Np)
    has_res = residual is not None
    rp = _pad2(residual, Mp, Np) if has_res else None

    grid = (Mp // tm, Np // tn, K // tk)
    nk = grid[2]

    def kernel(*refs):
        if has_res:
            x_ref, w_ref, b_ref, r_ref, o_ref, acc_ref = refs
        else:
            x_ref, w_ref, b_ref, o_ref, acc_ref = refs
            r_ref = None
        kk = pl.program_id(2)

        @pl.when(kk == 0)
        def _init():
            acc_ref[...] = jnp.zeros_like(acc_ref)

        acc_ref[...] += jnp.dot(x_ref[...].astype(MXU_DTYPE),
                                w_ref[...].astype(MXU_DTYPE),
                                preferred_element_type=jnp.float32)

        @pl.when(kk == nk - 1)
        def _finalize():
            y = acc_ref[...] + b_ref[...]
            if activation == 'relu':
                y = jnp.maximum(y, 0.0)
            if has_res:
                y = y + r_ref[...]
            if logsoftmax:
                if Np != N:   # keep padded columns out of the lse
                    col = jax.lax.broadcasted_iota(jnp.int32, y.shape, 1)
                    y = jnp.where(col < N, y, -1e30)
                m = jnp.max(y, axis=-1, keepdims=True)
                y = y - m - jnp.log(jnp.sum(jnp.exp(y - m), axis=-1, keepdims=True))
            o_ref[...] = y

    in_specs = [
        pl.BlockSpec((tm, tk), lambda i, j, k: (i, k)),
        pl.BlockSpec((tk, tn), lambda i, j, k: (k, j)),
        pl.BlockSpec((1, tn), lambda i, j, k: (0, j)),
    ]
    operands = [xp, wp, bp]
    if has_res:
        in_specs.append(pl.BlockSpec((tm, tn), lambda i, j, k: (i, j)))
        operands.append(rp)

    out = pl.pallas_call(
        kernel,
        out_shape=jax.ShapeDtypeStruct((Mp, Np), jnp.float32),
        grid=grid,
        in_specs=in_specs,
        out_specs=pl.BlockSpec((tm, tn), lambda i, j, k: (i, j)),
        scratch_shapes=[pltpu.VMEM((tm, tn), jnp.float32)],
        compiler_params=pltpu.CompilerParams(
            dimension_semantics=("parallel", "parallel", "arbitrary")),
    )(*operands)
    return out[:M, :N]


def pallas_ln_linear(x, gamma, beta, w, b, *, activation=None, eps=1e-5):
    """Fused LayerNorm(x) @ w + b (optional ReLU).

    x:(M,D) gamma,beta:(D,) w:(D,N) b:(N,).  D (=d_model) stays a single K block
    so LN stats use the true feature dim; LN is recomputed per N tile (cheap)
    instead of writing the normalized activation back to HBM.
    """
    M, D = x.shape
    N = w.shape[1]
    Mp, tm = _row_tiles(M)
    Np, tn = _col_tiles(N)

    xp = _pad2(x, Mp, D)
    wp = _pad2(w, D, Np)
    bp = _pad2(b.reshape(1, N), 1, Np)
    g2 = gamma.reshape(1, D)
    bt2 = beta.reshape(1, D)

    def kernel(x_ref, g_ref, bt_ref, w_ref, b_ref, o_ref):
        xx = x_ref[...]
        mu = jnp.mean(xx, axis=-1, keepdims=True)
        var = jnp.mean(jnp.square(xx - mu), axis=-1, keepdims=True)
        xn = (xx - mu) * jax.lax.rsqrt(var + eps) * g_ref[...] + bt_ref[...]
        y = jnp.dot(xn.astype(MXU_DTYPE), w_ref[...].astype(MXU_DTYPE),
                    preferred_element_type=jnp.float32) + b_ref[...]
        if activation == 'relu':
            y = jnp.maximum(y, 0.0)
        o_ref[...] = y

    out = pl.pallas_call(
        kernel,
        out_shape=jax.ShapeDtypeStruct((Mp, Np), jnp.float32),
        grid=(Mp // tm, Np // tn),
        in_specs=[
            pl.BlockSpec((tm, D), lambda i, j: (i, 0)),
            pl.BlockSpec((1, D), lambda i, j: (0, 0)),
            pl.BlockSpec((1, D), lambda i, j: (0, 0)),
            pl.BlockSpec((D, tn), lambda i, j: (0, j)),
            pl.BlockSpec((1, tn), lambda i, j: (0, j)),
        ],
        out_specs=pl.BlockSpec((tm, tn), lambda i, j: (i, j)),
        compiler_params=pltpu.CompilerParams(
            dimension_semantics=("parallel", "parallel")),
    )(xp, g2, bt2, wp, bp)
    return out[:M, :N]


def pallas_layernorm(x, gamma, beta, eps=1e-5):
    """Standalone row-wise LayerNorm (used only for encoder_norm, whose output
    is itself returned as the encoder representation)."""
    M, D = x.shape
    Mp, tm = _row_tiles(M)
    xp = _pad2(x, Mp, D)

    def kernel(x_ref, g_ref, b_ref, o_ref):
        xx = x_ref[...]
        mu = jnp.mean(xx, axis=-1, keepdims=True)
        var = jnp.mean(jnp.square(xx - mu), axis=-1, keepdims=True)
        o_ref[...] = (xx - mu) * jax.lax.rsqrt(var + eps) * g_ref[...] + b_ref[...]

    out = pl.pallas_call(
        kernel,
        out_shape=jax.ShapeDtypeStruct((Mp, D), jnp.float32),
        grid=(Mp // tm,),
        in_specs=[pl.BlockSpec((tm, D), lambda i: (i, 0)),
                  pl.BlockSpec((1, D), lambda i: (0, 0)),
                  pl.BlockSpec((1, D), lambda i: (0, 0))],
        out_specs=pl.BlockSpec((tm, D), lambda i: (i, 0)),
        compiler_params=pltpu.CompilerParams(dimension_semantics=("parallel",)),
    )(xp, gamma.reshape(1, D), beta.reshape(1, D))
    return out[:M]


def pallas_mha(q, kv, key_lengths, num_heads, causal):
    """Multi-head scaled-dot-product attention, heads packed in the last dim.

      q:  (B, Tq, D)   packed per-head queries  (D = H*dh)
      kv: (B, Tk, 2*D) packed per-head keys|values
      key_lengths: (B,) int32 valid key length (padding mask built in-kernel)
    Returns (out:(B,Tq,D), attn:(B,Tq,Tk) head-averaged probabilities).
    """
    B, Tq, D = q.shape
    Tk = kv.shape[1]
    dh = D // num_heads
    scale = 1.0 / math.sqrt(dh)

    tq = min(128, _round_up(Tq, 8))
    Tqp = _round_up(Tq, tq)
    if Tqp != Tq:
        q = jnp.pad(q, ((0, 0), (0, Tqp - Tq), (0, 0)))

    # TODO(synk): for long sequences, stream Tk with a flash-style online
    # softmax instead of holding the full (tq, Tk) score matrix per head.
    def kernel(len_ref, q_ref, kv_ref, o_ref, a_ref):
        b = pl.program_id(0)
        qi = pl.program_id(1)
        klen = len_ref[b]

        col = jax.lax.broadcasted_iota(jnp.int32, (tq, Tk), 1)
        valid = col < klen
        if causal:
            row = jax.lax.broadcasted_iota(jnp.int32, (tq, Tk), 0) + qi * tq
            valid = jnp.logical_and(valid, col <= row)

        q_full = q_ref[0]     # (tq, D)   f32
        kv_full = kv_ref[0]   # (Tk, 2D)  f32

        a_acc = jnp.zeros((tq, Tk), jnp.float32)
        inv_h = 1.0 / num_heads
        outs = []
        for h in range(num_heads):
            qh = (q_full[:, h * dh:(h + 1) * dh] * scale).astype(MXU_DTYPE)
            kh = kv_full[:, h * dh:(h + 1) * dh].astype(MXU_DTYPE)
            vh = kv_full[:, D + h * dh:D + (h + 1) * dh].astype(MXU_DTYPE)
            s = jax.lax.dot_general(qh, kh, (((1,), (1,)), ((), ())),
                                    preferred_element_type=jnp.float32)
            s = jnp.where(valid, s, NEG_INF)
            s = s - jnp.max(s, axis=-1, keepdims=True)
            e = jnp.exp(s)
            p = e * pl.reciprocal(jnp.sum(e, axis=-1, keepdims=True), approx=True)
            a_acc = a_acc + p * inv_h
            outs.append(jnp.dot(p.astype(MXU_DTYPE), vh,
                                preferred_element_type=jnp.float32))

        o_ref[0] = jnp.concatenate(outs, axis=-1)   # single lane-dense store
        a_ref[0] = a_acc

    out, attn = pl.pallas_call(
        kernel,
        out_shape=(jax.ShapeDtypeStruct((B, Tqp, D), jnp.float32),
                   jax.ShapeDtypeStruct((B, Tqp, Tk), jnp.float32)),
        grid_spec=pltpu.PrefetchScalarGridSpec(
            num_scalar_prefetch=1,
            grid=(B, Tqp // tq),
            in_specs=[
                pl.BlockSpec((1, tq, D), lambda b, i, lens: (b, i, 0)),
                pl.BlockSpec((1, Tk, 2 * D), lambda b, i, lens: (b, 0, 0)),
            ],
            out_specs=(
                pl.BlockSpec((1, tq, D), lambda b, i, lens: (b, i, 0)),
                pl.BlockSpec((1, tq, Tk), lambda b, i, lens: (b, i, 0)),
            ),
        ),
        compiler_params=pltpu.CompilerParams(
            dimension_semantics=("parallel", "parallel")),
    )(key_lengths.astype(jnp.int32), q, kv)

    if Tqp != Tq:
        out = out[:, :Tq]
        attn = attn[:, :Tq]
    return out, attn


# ----------------------------------------------------------------------------
# Model building blocks (thin JAX glue around the fused kernels)
# ----------------------------------------------------------------------------

def encoder_layer(lp, x, key_lengths, num_heads):
    """Pre-LN self-attention encoder layer (fused LN+QKV, fused epilogues)."""
    B, T, D = x.shape
    x_flat = x.reshape(-1, D)

    qkv = pallas_ln_linear(x_flat, lp['ln1']['g'], lp['ln1']['b'],
                           lp['mha']['w_qkv'], lp['mha']['b_qkv']).reshape(B, T, 3 * D)
    attn_out, attn_w = pallas_mha(qkv[..., :D], qkv[..., D:], key_lengths,
                                  num_heads, causal=False)
    x_flat = pallas_linear(attn_out.reshape(-1, D), lp['mha']['wo'], lp['mha']['bo'],
                           residual=x_flat)

    h = pallas_ln_linear(x_flat, lp['ln2']['g'], lp['ln2']['b'],
                         lp['ffn1']['w'], lp['ffn1']['b'], activation='relu')
    x_flat = pallas_linear(h, lp['ffn2']['w'], lp['ffn2']['b'], residual=x_flat)
    return x_flat.reshape(B, T, D), attn_w


def decoder_layer(lp, x, enc_out, tgt_key_lengths, src_key_lengths, num_heads):
    """Pre-LN decoder layer: causal self-attn + cross-attn + FFN."""
    B, T, D = x.shape
    S = enc_out.shape[1]
    x_flat = x.reshape(-1, D)

    # --- masked self-attention ---
    qkv = pallas_ln_linear(x_flat, lp['ln1']['g'], lp['ln1']['b'],
                           lp['self_mha']['w_qkv'], lp['self_mha']['b_qkv']
                           ).reshape(B, T, 3 * D)
    sa_out, sa_w = pallas_mha(qkv[..., :D], qkv[..., D:], tgt_key_lengths,
                              num_heads, causal=True)
    x_flat = pallas_linear(sa_out.reshape(-1, D), lp['self_mha']['wo'],
                           lp['self_mha']['bo'], residual=x_flat)

    # --- cross-attention ---
    q = pallas_ln_linear(x_flat, lp['ln2']['g'], lp['ln2']['b'],
                         lp['cross_mha']['wq'], lp['cross_mha']['bq']).reshape(B, T, D)
    kv = pallas_linear(enc_out.reshape(-1, D), lp['cross_mha']['w_kv'],
                       lp['cross_mha']['b_kv']).reshape(B, S, 2 * D)
    ca_out, ca_w = pallas_mha(q, kv, src_key_lengths, num_heads, causal=False)
    x_flat = pallas_linear(ca_out.reshape(-1, D), lp['cross_mha']['wo'],
                           lp['cross_mha']['bo'], residual=x_flat)

    # --- feed-forward ---
    h = pallas_ln_linear(x_flat, lp['ln3']['g'], lp['ln3']['b'],
                         lp['ffn1']['w'], lp['ffn1']['b'], activation='relu')
    x_flat = pallas_linear(h, lp['ffn2']['w'], lp['ffn2']['b'], residual=x_flat)
    return x_flat.reshape(B, T, D), sa_w, ca_w


def sinusoidal_pe(max_len, d_model):
    pos = jnp.arange(max_len, dtype=jnp.float32)[:, None]
    div = jnp.exp(jnp.arange(0, d_model, 2, dtype=jnp.float32)
                  * (-math.log(10000.0) / d_model))
    pe = jnp.zeros((max_len, d_model), jnp.float32)
    pe = pe.at[:, 0::2].set(jnp.sin(pos * div))
    pe = pe.at[:, 1::2].set(jnp.cos(pos * div))
    return pe


# ----------------------------------------------------------------------------
# Full forward
# ----------------------------------------------------------------------------

def encode(params, cfg, padded_sources, source_lengths):
    B, S, Din = padded_sources.shape
    tr = cfg['time_reduction']
    D = cfg['d_model']
    Sp = S // tr

    # SpeechEmbedding ('conv'): Conv1d(input_dim, d_model, k=tr, stride=tr)+ReLU
    # implemented as im2col + fused Pallas matmul.
    # TODO(synk): 'lstm' / 'both' SpeechEmbedding variants not implemented; when
    # porting real Conv1d weights, permute (out,in,k)->(k*in,out) to match the
    # time-major im2col window layout used here.
    x = padded_sources[:, :Sp * tr, :].reshape(B, Sp, tr * Din)
    x = pallas_linear(x.reshape(-1, tr * Din),
                      params['src_emb']['w'], params['src_emb']['b'],
                      activation='relu').reshape(B, Sp, D)
    x_lengths = (source_lengths // tr).astype(jnp.int32)

    if not cfg['skip_encoder_pe']:
        x = x + params['pe'][None, :Sp, :]
    # dropout: identity in eval

    pad_mask_src = jnp.arange(Sp)[None, :] >= x_lengths[:, None]  # True = pad

    running_att = {}
    for i, lp in enumerate(params['enc_layers']):
        x, attn = encoder_layer(lp, x, x_lengths, cfg['num_encoder_heads'])
        running_att[f'layer{i + 1}_enc_self'] = attn

    x_flat = pallas_layernorm(x.reshape(-1, D),
                              params['encoder_norm']['g'], params['encoder_norm']['b'])
    x = x_flat.reshape(B, Sp, D)

    # CTC head: linear + log-softmax fused in one kernel.
    ctc_logprobs = pallas_linear(x_flat, params['ctc_linear']['w'],
                                 params['ctc_linear']['b'],
                                 logsoftmax=True).reshape(B, Sp, cfg['num_classes'])
    ctc_inputs = {'log_probs': jnp.transpose(ctc_logprobs, (1, 0, 2)),
                  'lengths': x_lengths}
    return x, pad_mask_src, x_lengths, running_att, ctc_inputs


def decode(params, cfg, padded_targets, encoder_output, target_lengths, src_key_lengths):
    B, T = padded_targets.shape
    D = cfg['d_model']

    if target_lengths is not None:
        tgt_key_lengths = target_lengths.astype(jnp.int32)
    else:
        tgt_key_lengths = jnp.full((B,), T, jnp.int32)

    x = params['target_embedding'][padded_targets]   # embedding gather (glue)
    if not cfg['skip_decoder_pe']:
        x = x + params['pe'][None, :T, :]
    # dropout / layer-drop: identity in eval

    running_att = {}
    for i, lp in enumerate(params['dec_layers']):
        x, sa, ca = decoder_layer(lp, x, encoder_output, tgt_key_lengths,
                                  src_key_lengths, cfg['num_decoder_heads'])
        running_att[f'layer{i + 1}_dec_self'] = sa
        running_att[f'layer{i + 1}_dec_cross'] = ca

    # decoder_norm + final_linear fused into one kernel.
    seq_out = pallas_ln_linear(x.reshape(-1, D),
                               params['decoder_norm']['g'], params['decoder_norm']['b'],
                               params['final_linear']['w'], params['final_linear']['b']
                               ).reshape(B, T, cfg['num_classes'])
    return seq_out, running_att


def forward(params, cfg, padded_sources, padded_targets, source_lengths, target_lengths):
    enc_out, pad_mask_src, enc_lengths, enc_att, ctc_inputs = encode(
        params, cfg, padded_sources, source_lengths)
    seq_out, dec_att = decode(params, cfg, padded_targets, enc_out,
                              target_lengths, enc_lengths)
    running_att = {**enc_att, **dec_att}
    return seq_out, running_att, ctc_inputs


# ----------------------------------------------------------------------------
# Deterministic parameter init
# ----------------------------------------------------------------------------

def init_linear(key, din, dout, scale=0.02):
    return {'w': scale * jax.random.normal(key, (din, dout), jnp.float32),
            'b': jnp.zeros((dout,), jnp.float32)}


def init_ln(d):
    return {'g': jnp.ones((d,), jnp.float32), 'b': jnp.zeros((d,), jnp.float32)}


def init_self_mha(key, d):
    k = jax.random.split(key, 2)
    return {'w_qkv': 0.02 * jax.random.normal(k[0], (d, 3 * d), jnp.float32),
            'b_qkv': jnp.zeros((3 * d,), jnp.float32),
            'wo': 0.02 * jax.random.normal(k[1], (d, d), jnp.float32),
            'bo': jnp.zeros((d,), jnp.float32)}


def init_cross_mha(key, d):
    k = jax.random.split(key, 3)
    return {'wq': 0.02 * jax.random.normal(k[0], (d, d), jnp.float32),
            'bq': jnp.zeros((d,), jnp.float32),
            'w_kv': 0.02 * jax.random.normal(k[1], (d, 2 * d), jnp.float32),
            'b_kv': jnp.zeros((2 * d,), jnp.float32),
            'wo': 0.02 * jax.random.normal(k[2], (d, d), jnp.float32),
            'bo': jnp.zeros((d,), jnp.float32)}


def init_enc_layer(key, d, d_ff):
    k = jax.random.split(key, 3)
    return {'ln1': init_ln(d), 'mha': init_self_mha(k[0], d), 'ln2': init_ln(d),
            'ffn1': init_linear(k[1], d, d_ff), 'ffn2': init_linear(k[2], d_ff, d)}


def init_dec_layer(key, d, d_ff):
    k = jax.random.split(key, 4)
    return {'ln1': init_ln(d), 'self_mha': init_self_mha(k[0], d),
            'ln2': init_ln(d), 'cross_mha': init_cross_mha(k[1], d),
            'ln3': init_ln(d),
            'ffn1': init_linear(k[2], d, d_ff), 'ffn2': init_linear(k[3], d_ff, d)}


def init_params(key, cfg):
    keys = jax.random.split(key, 8)
    d = cfg['d_model']
    return {
        'src_emb': init_linear(keys[0], cfg['time_reduction'] * cfg['input_dim'], d),
        'target_embedding': 0.02 * jax.random.normal(
            keys[1], (cfg['num_classes'], d), jnp.float32),
        'pe': sinusoidal_pe(cfg['max_len'], d),
        'enc_layers': [init_enc_layer(k, d, cfg['d_ff_encoder'])
                       for k in jax.random.split(keys[2], cfg['num_encoder_layers'])],
        'dec_layers': [init_dec_layer(k, d, cfg['d_ff_decoder'])
                       for k in jax.random.split(keys[3], cfg['num_decoder_layers'])],
        'encoder_norm': init_ln(d),
        'decoder_norm': init_ln(d),
        'final_linear': init_linear(keys[4], d, cfg['num_classes']),
        'ctc_linear': init_linear(keys[5], d, cfg['num_classes']),
    }


# ----------------------------------------------------------------------------
# Main
# ----------------------------------------------------------------------------

if __name__ == "__main__":
    cfg = dict(
        input_dim=16, time_reduction=2, reduction_method='conv',
        num_encoder_layers=2, num_encoder_heads=2, d_ff_encoder=64,
        num_decoder_layers=2, num_decoder_heads=2, d_ff_decoder=64,
        d_model=32, dropout=0.1, max_len=64, num_classes=12,
        skip_encoder_pe=False, skip_decoder_pe=False,
    )

    key = jax.random.PRNGKey(0)
    kp, ks, kt = jax.random.split(key, 3)
    params = init_params(kp, cfg)

    B, S, T = 2, 16, 8
    padded_sources = jax.random.normal(ks, (B, S, cfg['input_dim']), jnp.float32)
    padded_targets = jax.random.randint(kt, (B, T), 0, cfg['num_classes'])
    source_lengths = jnp.array([16, 12], jnp.int32)
    target_lengths = jnp.array([8, 6], jnp.int32)

    seq_out, running_att, ctc_inputs = forward(
        params, cfg, padded_sources, padded_targets, source_lengths, target_lengths)

    jax.block_until_ready(seq_out)
    jax.block_until_ready(ctc_inputs['log_probs'])
    for v in running_att.values():
        jax.block_until_ready(v)

    assert seq_out.shape == (B, T, cfg['num_classes'])
    assert ctc_inputs['log_probs'].shape == (S // cfg['time_reduction'], B, cfg['num_classes'])
    assert running_att['layer1_enc_self'].shape == (B, S // cfg['time_reduction'],
                                                    S // cfg['time_reduction'])
    assert running_att['layer1_dec_cross'].shape == (B, T, S // cfg['time_reduction'])
    print("KERNEL_OK")
</pallas_src>

<mosaic_0001>
module attributes {stable_mosaic.version = 11 : i64} {
  func.func @kernel(%arg0: i32, %arg1: i32, %arg2: i32, %arg3: memref<16x32xf32, #tpu.memory_space<vmem>>, %arg4: memref<32x128xf32, #tpu.memory_space<vmem>>, %arg5: memref<1x128xf32, #tpu.memory_space<vmem>>, %arg6: memref<16x128xf32, #tpu.memory_space<vmem>>, %arg7: memref<16x128xf32, #tpu.memory_space<vmem>>) attributes {dimension_semantics = [#tpu.dimension_semantics<parallel>, #tpu.dimension_semantics<parallel>, #tpu.dimension_semantics<arbitrary>], iteration_bounds = array<i64: 1, 1, 1>, scalar_prefetch = 0 : i64, scratch_operands = 1 : i64, tpu.core_type = #tpu.core_type<tc>, window_params = [{transform_indices = @transform_0, window_bounds = array<i64: 16, 32>}, {transform_indices = @transform_1, window_bounds = array<i64: 32, 128>}, {transform_indices = @transform_2, window_bounds = array<i64: 1, 128>}, {transform_indices = @transform_3, window_bounds = array<i64: 16, 128>}]} {
    %c0_i32 = arith.constant 0 : i32
    %0 = arith.cmpi eq, %arg2, %c0_i32 : i32
    %1 = arith.extui %0 : i1 to i32
    %c0_i32_0 = arith.constant 0 : i32
    %2 = arith.cmpi ne, %1, %c0_i32_0 : i32
    scf.if %2 {
      %cst_10 = arith.constant 0.000000e+00 : f32
      %14 = vector.broadcast %cst_10 : f32 to vector<16x128xf32>
      %c0_11 = arith.constant 0 : index
      %c0_12 = arith.constant 0 : index
      %15 = vector.load %arg7[%c0_11, %c0_12] : memref<16x128xf32, #tpu.memory_space<vmem>>, vector<16x128xf32>
      tpu.vector_store %arg7[%c0_11, %c0_12], %14 {strides = array<i32>} : memref<16x128xf32, #tpu.memory_space<vmem>>, vector<16x128xf32>,
    } else {
    }
    %c0 = arith.constant 0 : index
    %c0_1 = arith.constant 0 : index
    %3 = vector.load %arg7[%c0, %c0_1] : memref<16x128xf32, #tpu.memory_space<vmem>>, vector<16x128xf32>
    %c0_2 = arith.constant 0 : index
    %c0_3 = arith.constant 0 : index
    %4 = vector.load %arg3[%c0_2, %c0_3] : memref<16x32xf32, #tpu.memory_space<vmem>>, vector<16x32xf32>
    %5 = arith.truncf %4 : vector<16x32xf32> to vector<16x32xbf16>
    %c0_4 = arith.constant 0 : index
    %c0_5 = arith.constant 0 : index
    %6 = vector.load %arg4[%c0_4, %c0_5] : memref<32x128xf32, #tpu.memory_space<vmem>>, vector<32x128xf32>
    %7 = arith.truncf %6 : vector<32x128xf32> to vector<32x128xbf16>
    %cst = arith.constant dense<0.000000e+00> : vector<16x128xf32>
    %8 = tpu.matmul %5, %7, %cst {dimension_numbers = #tpu.dot_dimension_numbers<[1], [0], [0], [1], [0, 0, 1, 1], [], []>} : vector<16x32xbf16>, vector<32x128xbf16>, vector<16x128xf32> -> vector<16x128xf32>
    %9 = arith.addf %3, %8 : vector<16x128xf32>
    %c0_6 = arith.constant 0 : index
    %c0_7 = arith.constant 0 : index
    %10 = vector.load %arg7[%c0_6, %c0_7] : memref<16x128xf32, #tpu.memory_space<vmem>>, vector<16x128xf32>
    tpu.vector_store %arg7[%c0_6, %c0_7], %9 {strides = array<i32>} : memref<16x128xf32, #tpu.memory_space<vmem>>, vector<16x128xf32>,
    %c0_i32_8 = arith.constant 0 : i32
    %11 = arith.cmpi eq, %arg2, %c0_i32_8 : i32
    %12 = arith.extui %11 : i1 to i32
    %c0_i32_9 = arith.constant 0 : i32
    %13 = arith.cmpi ne, %12, %c0_i32_9 : i32
    scf.if %13 {
      %c0_10 = arith.constant 0 : index
      %c0_11 = arith.constant 0 : index
      %14 = vector.load %arg7[%c0_10, %c0_11] : memref<16x128xf32, #tpu.memory_space<vmem>>, vector<16x128xf32>
      %c0_12 = arith.constant 0 : index
      %c0_13 = arith.constant 0 : index
      %15 = vector.load %arg5[%c0_12, %c0_13] : memref<1x128xf32, #tpu.memory_space<vmem>>, vector<1x128xf32>
      %16 = vector.broadcast %15 : vector<1x128xf32> to vector<16x128xf32>
      %17 = arith.addf %14, %16 : vector<16x128xf32>
      %cst_14 = arith.constant 0.000000e+00 : f32
      %18 = vector.broadcast %cst_14 : f32 to vector<16x128xf32>
      %19 = arith.maximumf %17, %18 : vector<16x128xf32>
      %c0_15 = arith.constant 0 : index
      %c0_16 = arith.constant 0 : index
      %20 = vector.load %arg6[%c0_15, %c0_16] : memref<16x128xf32, #tpu.memory_space<vmem>>, vector<16x128xf32>
      tpu.vector_store %arg6[%c0_15, %c0_16], %19 {strides = array<i32>} : memref<16x128xf32, #tpu.memory_space<vmem>>, vector<16x128xf32>,
    } else {
    }
    return
  }
  func.func @transform_0(%arg0: i32, %arg1: i32, %arg2: i32) -> (i32, i32) {
    %c0_i32 = arith.constant 0 : i32
    return %arg0, %arg2 : i32, i32
  }
  func.func @transform_1(%arg0: i32, %arg1: i32, %arg2: i32) -> (i32, i32) {
    %c0_i32 = arith.constant 0 : i32
    return %arg2, %arg1 : i32, i32
  }
  func.func @transform_2(%arg0: i32, %arg1: i32, %arg2: i32) -> (i32, i32) {
    %c0_i32 = arith.constant 0 : i32
    %c0_i32_0 = arith.constant 0 : i32
    return %c0_i32, %arg1 : i32, i32
  }
  func.func @transform_3(%arg0: i32, %arg1: i32, %arg2: i32) -> (i32, i32) {
    %c0_i32 = arith.constant 0 : i32
    return %arg0, %arg1 : i32, i32
  }
}

</mosaic_0001>

<bundles_post_ra>
// kernel: tpu_custom_call.1
= control target key start
LH: loop header
LB: loop body
LE: loop exit
PB: predicated region body
PF: predicated region fallthrough
CT: control target
= control target key end

     0   :  { %8 = vsyncpa [#allocation4], 0  ;;  %s313_s0 = inlined_call_operand.hbm [shape: f32[16,32], index: 0, kind: input, shape index: {}]   ;;  %s314_s1 = inlined_call_operand.hbm [shape: f32[32,128], index: 1, kind: input, shape index: {}]   ;;  %s315_s2 = inlined_call_operand.vmem [shape: f32[1,128], index: 2, kind: input, shape index: {}]   ;;  %s316_s3 = inlined_call_operand.hbm [shape: f32[16,128], index: 3, kind: output, shape index: {}]  }
   0x1   :  { %9 = vsyncpa [#allocation7], 0 }
   0x2   :  { %10 = vsyncpa [#allocation5], 0  ;;  %s238_s12 = smov [#allocation3]   ;;  %s166_s16 = scalar_lea.hbm %s313_s0, 256 }
   0x3   :  { %s16_s13 = sshll.u32 %s238_s12, 4  ;;  %p167_p0 = scmp.ne.s32.totalorder %s313_s0, %s166_s16  ;;  %s17_s13 = int_to_ptr.vmem [resolvable:$true] %s16_s13 }
   0x4   :  { %p170_p1 = scmp.lt.u32.totalorder %s166_s16, %s313_s0 }
   0x6   :  { %p172_p2 = pnand %p170_p1, %p167_p0 }
   0x8   :  { %175 = shalt.err (!%p172_p2)
}
   0x9   :  { %s176_s21 = scalar_lea.vmem %s17_s13, 256  ;;  %p181_p4 = scmp.lt.s32.totalorder %s17_s13, %s17_s13 }
   0xa   :  { %p177_p3 = scmp.ne.s32.totalorder %s17_s13, %s176_s21  ;;  %p182_p5 = scmp.lt.s32.totalorder %s176_s21, %s176_s21 }
   0xc   :  { %p183_p6 = por %p182_p5, %p181_p4 }
   0xe   :  { %p184_p7 = pnand %p183_p6, %p177_p3 }
  0x10   :  { %187 = shalt.err (!%p184_p7)
}
  0x11   :  { %s239_s22 = smov 128   ;;  %s240_s23 = smov 8  }
  0x12   :  { %22 = dma.hbm_to_vmem [thread:$0]  %s313_s0, 256, %s17_s13, [#allocation4], %s239_s22, %s239_s22, %s240_s23  }
  0x13   :  { %s241_s26 = smov [#allocation6]   ;;  %s188_s30 = scalar_lea.hbm %s314_s1, 512 }
  0x14   :  { %s28_s27 = sshll.u32 %s241_s26, 4  ;;  %p189_p8 = scmp.ne.s32.totalorder %s314_s1, %s188_s30  ;;  %s29_s27 = int_to_ptr.vmem [resolvable:$true] %s28_s27 }
  0x15   :  { %p192_p9 = scmp.lt.u32.totalorder %s188_s30, %s314_s1 }
  0x17   :  { %p194_p10 = pnand %p192_p9, %p189_p8 }
  0x19   :  { %197 = shalt.err (!%p194_p10)
}
  0x1a   :  { %s198_s8 = scalar_lea.vmem %s29_s27, 512  ;;  %p203_p12 = scmp.lt.s32.totalorder %s29_s27, %s29_s27 }
  0x1b   :  { %p199_p11 = scmp.ne.s32.totalorder %s29_s27, %s198_s8  ;;  %p204_p13 = scmp.lt.s32.totalorder %s198_s8, %s198_s8 }
  0x1d   :  { %p205_p0 = por %p204_p13, %p203_p12 }
  0x1f   :  { %p206_p1 = pnand %p205_p0, %p199_p11 }
  0x21   :  { %209 = shalt.err (!%p206_p1)
}
  0x22   :  { %34 = dma.hbm_to_vmem [thread:$0]  %s314_s1, 512, %s29_s27, [#allocation7], %s239_s22, %s239_s22, %s240_s23  }
  0x23   :  { %232 = dma.done.wait [#allocation4], 256  }
  0x24   :  { %233 = vsyncadd [#allocation4], 4294967040 }
  0x25   :  { %234 = dma.done.wait [#allocation7], 512  }
  0x26   :  { %235 = vsyncadd [#allocation7], 4294966784  ;;  %v242_v0 = vmov 0.0   ;;  %vm243_vm0 = vmmov 0   ;;  %v55_v1 = vld [vmem:[#allocation6] sm:$0xff]  ;;  %v56_v2 = vld [vmem:[#allocation6 + $0x8] sm:$0xff] }
  0x27   :  { %151 = vmatprep.subr.bf16.mxu0 %v242_v0  ;;  %155 = vmatprep.mubr.msk.bf16.mxu0 %vm243_vm0, %v242_v0  ;;  %v57_v3 = vld [vmem:[#allocation6 + $0x10] sm:$0xff]  ;;  %v59_v4 = vpack.c.bf16 %v56_v2, %v55_v1  ;;  %v58_v5 = vld [vmem:[#allocation6 + $0x18] sm:$0xff]  ;;  %vm61_vm1 = vcmask 261120   ;;  %s244_s11 = smov [#allocation8]  }
  0x28   :  { %v60_v6 = vpack.c.bf16 %v58_v5, %v57_v3  ;;  %v52_v7 = vld [vmem:[#allocation3] sm:$0xff]  ;;  %v53_v8 = vld [vmem:[#allocation3 + $0x8] sm:$0xff]  ;;  %s133_s12 = sshll.u32 %s244_s11, 4  ;;  %s134_s12 = int_to_ptr.vmem [resolvable:$true] %s133_s12 }
  0x29   :  { %152 = vmatpush3.bf16.msra.mxu0 %v59_v4  ;;  %v54_v9 = vpack.c.bf16 %v53_v8, %v52_v7  ;;  %v147_v10 = vld [vmem:[%s315_s2] ss:$0 sm:$0xff]  ;;  %s210_s13 = scalar_lea.vmem %s134_s12, 256  ;;  %p215_p3 = scmp.lt.s32.totalorder %s134_s12, %s134_s12 }
  0x2a   :  { %153 = vmatprep.subr.bf16.mxu0 %v242_v0  ;;  %p211_p2 = scmp.ne.s32.totalorder %s134_s12, %s210_s13  ;;  %p216_p4 = scmp.lt.s32.totalorder %s210_s13, %s210_s13 }
  0x2c   :  { %p217_p5 = por %p216_p4, %p215_p3 }
  0x2d   :  { %154 = vmatpush3.bf16.msra.mxu0 %v60_v6 }
  0x2e   :  { %p218_p6 = pnand %p217_p5, %p211_p2 }
  0x30   :  { %156 = vmatmul.mubr.msk.bf16.vlgmr.msra.gmra.mrb[0].mxu0 %vm61_vm1, %v54_v9 }
 0x103   :  { %v99_v11 = vpop.f32.mrb[0].mxu0 }
 0x104   :  { %v122_v12 = vadd.f32 %v147_v10, %v99_v11  ;;  %v157_v13 = vpop.f32.mrb[1].mxu0 }
 0x105   :  { %v102_v14 = vpop.f32.mrb[2].mxu0 }
 0x106   :  { %v124_v15 = vmax.f32 %v122_v12, 0.0  ;;  %v123_v16 = vadd.f32 %v147_v10, %v102_v14  ;;  %v158_v17 = vpop.f32.mrb[3].mxu0 }
 0x108   :  { %126 = vst [vmem:[#allocation8] sm:$0xff] %v124_v15  ;;  %v125_v18 = vmax.f32 %v123_v16, 0.0 }
 0x10a   :  { %127 = vst [vmem:[#allocation8 + $0x8] sm:$0xff] %v125_v18 }
 0x10b   :  { %221 = shalt.err (!%p218_p6)
}
 0x10c   :  { %s222_s15 = scalar_lea.hbm %s316_s3, 256 }
 0x10d   :  { %p223_p7 = scmp.ne.s32.totalorder %s316_s3, %s222_s15  ;;  %p226_p8 = scmp.lt.u32.totalorder %s222_s15, %s316_s3 }
 0x10f   :  { %p228_p9 = pnand %p226_p8, %p223_p7 }
 0x111   :  { %231 = shalt.err (!%p228_p9)
}
 0x112   :  { %139 = dma.vmem_to_hbm [thread:$0]  %s134_s12, 256, %s316_s3, [#allocation5], %s239_s22, %s239_s22, %s240_s23  }
 0x113   :  { %236 = dma.done.wait [#allocation5], 256  }
 0x114   :  { %237 = vsyncadd [#allocation5], 4294967040 }
 0x115   :  { %143 = vsyncpa [#allocation4], 1 }
 0x116   :  { %144 = vsyncpa [#allocation7], 1 }
 0x117   :  { %145 = vsyncpa [#allocation5], 1 }

</bundles_post_ra>
